<compile_context>
chip_gen: v6e
topology: v6e:2x2x1
jax: 0.10.0
libtpu: 0.0.40
codegen_flags: <defaults>
</compile_context>

<pallas_src>
import functools

import jax
import jax.numpy as jnp
import numpy as np
from jax.experimental import pallas as pl
from jax.experimental.pallas import tpu as pltpu  # noqa: F401  (kept for TPU backend)

# ------------------------- model hyperparameters (args) -----------------------
INPUT_DIM = 4        # args.input_dim
LSTM_HIDDEN = 32     # args.lstm_hidden_dim
LSTM_LAYERS = 2      # args.lstm_layer_dim  (kernel hard-codes 2 layers)
SEQ_DIM = 8          # args.seq_dim
L1_CLASS = 64        # args.layer1_class
L2_CLASS = 32        # args.layer2_class
L3_CLASS = 4         # args.layer3_class
L1_REG = 64          # args.layer1_reg
BATCH = 2

LANES = 128                          # TPU lane width; all packed slabs use it
GATES = 4 * LSTM_HIDDEN              # 128: LSTM gate width (i|f|g|o)
HEAD1 = L1_CLASS + L1_REG            # 128: fused fc1|fc4 output lanes
FEAT = SEQ_DIM * LSTM_HIDDEN         # 256: flattened LSTM feature width
REG_LANE0 = L2_CLASS                 # reg2 occupies lanes [32, 32+SEQ_DIM)
BPAD = 8                             # batch padded to one sublane tile
DPAD = 8                             # input dim padded to 8 (zero rows in w0)

assert GATES == LANES and HEAD1 == LANES
assert L2_CLASS + SEQ_DIM <= LANES and L3_CLASS <= REG_LANE0

# Weight-slab row offsets (each matrix starts on an 8-row boundary so static
# row slices never cross sublane-tile alignment).
OFF_W0 = 0                           # (DPAD, 128)  LSTM layer-0 (rows 4:8 zero)
OFF_W1 = OFF_W0 + DPAD               # 8   (H, 128) LSTM layer-1
OFF_W14 = OFF_W1 + LSTM_HIDDEN       # 40  (FEAT, 128) fused fc1|fc4
OFF_W25 = OFF_W14 + FEAT             # 296 (128, 128)  fused fc2|fc5 (zero-padded)
OFF_W3 = OFF_W25 + HEAD1             # 424 (128, 128)  fc3 (zero-padded)
WSLAB_ROWS = OFF_W3 + HEAD1          # 552
assert WSLAB_ROWS % 8 == 0

# Bias-slab rows: 0=b0, 1=b1, 2=b14, 3=b25, 4=b3, 5=reg-pass-through mask.
BSLAB_ROWS = 8


# --------------------------------- kernel -------------------------------------
def _lstm_classifier_kernel(x_ref, w_ref, b_ref, feat_ref, head_ref,
                            *, BPAD, S, H):
    def lstm_cell_zero_state(inp, w, bias):
        # Gate lane layout (PyTorch order): [i | f(dead) | g | o], H lanes
        # each.  With h_prev = c_prev = 0:  c = sigmoid(i)*tanh(g),
        # h = sigmoid(o)*tanh(c).  Bias = b_ih + b_hh (packed host-side).
        z = jnp.dot(inp, w, preferred_element_type=jnp.float32) + bias  # (N, 4H)
        sz = jax.nn.sigmoid(z)                            # full-vreg EUP
        tz = jnp.tanh(z)                                  # full-vreg EUP
        i_g = sz[:, 0 * H:1 * H]                          # static lane slices
        g_g = tz[:, 2 * H:3 * H]
        o_g = sz[:, 3 * H:4 * H]
        return o_g * jnp.tanh(i_g * g_g)                  # (N, H)

    # Two stacked LSTM layers (inter-layer dropout = identity at inference).
    x = x_ref[...]                                        # (S*BPAD, DPAD)
    h = lstm_cell_zero_state(x, w_ref[OFF_W0:OFF_W0 + DPAD, :], b_ref[0:1, :])
    h = lstm_cell_zero_state(h, w_ref[OFF_W1:OFF_W1 + H, :], b_ref[1:2, :])
    # h: (S*BPAD, H), rows are s-major: row s*BPAD + b  <->  sample (b, s).

    # out_total (lane-dense, (BPAD, S*H)) + fused fc1|fc4 accumulation.
    # The (S*BPAD, H) -> (BPAD, S*H) "reshape" is realized as S aligned
    # sublane slices + S partial-lane stores, and the matmul against the
    # fused (FEAT, 128) weight is a sum of S tiny (BPAD, H) @ (H, 128)
    # matmuls — no in-kernel reshape/transpose needed.
    cr_acc = jnp.zeros((BPAD, LANES), jnp.float32)
    for s in range(S):                                    # static unroll (S=8)
        hs = h[s * BPAD:(s + 1) * BPAD, :]                # (BPAD, H), 8-aligned
        feat_ref[:, s * H:(s + 1) * H] = hs
        cr_acc = cr_acc + jnp.dot(
            hs, w_ref[OFF_W14 + s * H:OFF_W14 + (s + 1) * H, :],
            preferred_element_type=jnp.float32)

    # cr = relu(feat @ [fc1w | fc4w] + [fc1b | fc4b]):
    #   c1 @ lanes 0:64, r1 @ lanes 64:128.
    cr = jnp.maximum(cr_acc + b_ref[2:3, :], 0.0)

    # s2 = cr @ W25 + b25 : pre-relu c2 @ lanes 0:32, reg2 (fc5, no
    # activation) @ lanes 32:40, zeros elsewhere (padded weights/bias).
    s2 = jnp.dot(cr, w_ref[OFF_W25:OFF_W25 + HEAD1, :],
                 preferred_element_type=jnp.float32) + b_ref[3:4, :]
    r2 = jnp.maximum(s2, 0.0)                             # lanes 0:32 = c2

    # head = r2 @ W3 + b3 + s2 * regmask :
    #   lanes 0:4   = c2 @ fc3w + fc3b            (output_class3)
    #   lanes 32:40 = reg2 (masked pass-through)  (output_reg2)
    head = (jnp.dot(r2, w_ref[OFF_W3:OFF_W3 + HEAD1, :],
                    preferred_element_type=jnp.float32)
            + b_ref[4:5, :] + s2 * b_ref[5:6, :])
    head_ref[...] = head                                  # one unmasked store


# --------------------------------- wrapper ------------------------------------
def lstm_classifier_forward(x, wslab, bslab):
    """x: (B, S, D) f32.  Returns (out_total, output_class3, output_reg3)."""
    B, S, D = x.shape
    H = LSTM_HIDDEN
    assert wslab.shape == (WSLAB_ROWS, LANES) and bslab.shape == (BSLAB_ROWS, LANES)
    assert B <= BPAD and D <= DPAD

    # Host-side layout plumbing (free): s-major rows, batch & input-dim padded
    # so every in-kernel slice is sublane-tile aligned.
    x_t = jnp.transpose(x, (1, 0, 2))                                  # (S, B, D)
    x_pad = jnp.zeros((S, BPAD, DPAD), jnp.float32).at[:, :B, :D].set(x_t)
    x_flat = x_pad.reshape(S * BPAD, DPAD)                             # (64, 8)

    def full(shape):
        # Full-array block, single grid step.
        return pl.BlockSpec(shape, lambda i: (0,) * len(shape))

    out_shapes = (
        jax.ShapeDtypeStruct((BPAD, S * H), jnp.float32),   # out_total (lane-dense)
        jax.ShapeDtypeStruct((BPAD, LANES), jnp.float32),   # class3 | reg2 packed
    )

    feat, head = pl.pallas_call(
        functools.partial(_lstm_classifier_kernel, BPAD=BPAD, S=S, H=H),
        grid=(1,),
        in_specs=[full(x_flat.shape), full(wslab.shape), full(bslab.shape)],
        out_specs=tuple(full(s.shape) for s in out_shapes),
        out_shape=out_shapes,
    )(x_flat, wslab, bslab)

    out_total = feat[:B].reshape(B, S, H)
    output_class3 = head[:B, 0:L3_CLASS]
    output_reg3 = head[:B, REG_LANE0:REG_LANE0 + S].reshape(B, S, 1)
    return out_total, output_class3, output_reg3


# --------------------------- deterministic params ------------------------------
def init_params(key):
    H, D, S = LSTM_HIDDEN, INPUT_DIM, SEQ_DIM
    ks = jax.random.split(key, 16)

    def u(k, shape, fan_in):
        bound = 1.0 / np.sqrt(fan_in)
        return jax.random.uniform(k, shape, jnp.float32, -bound, bound)

    # LSTM weights stored pre-transposed: (in, 4H), gate order i,f,g,o.
    # Biases = b_ih + b_hh (h_prev = 0 every step).
    return {
        "w0": u(ks[0], (D, 4 * H), H),
        "b0": u(ks[1], (1, 4 * H), H) + u(ks[2], (1, 4 * H), H),
        "w1": u(ks[3], (H, 4 * H), H),
        "b1": u(ks[4], (1, 4 * H), H) + u(ks[5], (1, 4 * H), H),
        "fc1w": u(ks[6], (S * H, L1_CLASS), S * H),
        "fc1b": u(ks[7], (1, L1_CLASS), S * H),
        "fc2w": u(ks[8], (L1_CLASS, L2_CLASS), L1_CLASS),
        "fc2b": u(ks[9], (1, L2_CLASS), L1_CLASS),
        "fc3w": u(ks[10], (L2_CLASS, L3_CLASS), L2_CLASS),
        "fc3b": u(ks[11], (1, L3_CLASS), L2_CLASS),
        "fc4w": u(ks[12], (S * H, L1_REG), S * H),
        "fc4b": u(ks[13], (1, L1_REG), S * H),
        "fc5w": u(ks[14], (L1_REG, S), L1_REG),
        "fc5b": u(ks[15], (1, S), L1_REG),
    }


def pack_params(p):
    """Pack the 14 tensors into one weight slab and one bias/mask slab
    (done once, host/XLA side; the kernel carves them with static slices)."""
    H = LSTM_HIDDEN

    def zero_forget(a):
        # Forget gate multiplies c_prev == 0 -> dead; zero its columns but
        # keep the slab 128-lane wide for lane-dense layout.
        return a.at[:, H:2 * H].set(0.0)

    w0p = jnp.pad(zero_forget(p["w0"]), ((0, DPAD - INPUT_DIM), (0, 0)))    # (8,128)
    w1p = zero_forget(p["w1"])                                              # (32,128)

    w14 = jnp.concatenate([p["fc1w"], p["fc4w"]], axis=1)                   # (256,128)
    b14 = jnp.concatenate([p["fc1b"], p["fc4b"]], axis=1)                   # (1,128)

    w25 = jnp.zeros((HEAD1, LANES), jnp.float32)
    w25 = w25.at[0:L1_CLASS, 0:L2_CLASS].set(p["fc2w"])
    w25 = w25.at[L1_CLASS:HEAD1, REG_LANE0:REG_LANE0 + SEQ_DIM].set(p["fc5w"])
    b25 = jnp.zeros((1, LANES), jnp.float32)
    b25 = b25.at[:, 0:L2_CLASS].set(p["fc2b"])
    b25 = b25.at[:, REG_LANE0:REG_LANE0 + SEQ_DIM].set(p["fc5b"])

    w3 = jnp.zeros((HEAD1, LANES), jnp.float32).at[0:L2_CLASS, 0:L3_CLASS].set(p["fc3w"])
    b3 = jnp.zeros((1, LANES), jnp.float32).at[:, 0:L3_CLASS].set(p["fc3b"])
    regmask = jnp.zeros((1, LANES), jnp.float32).at[
        :, REG_LANE0:REG_LANE0 + SEQ_DIM].set(1.0)

    wslab = jnp.concatenate([w0p, w1p, w14, w25, w3], axis=0)               # (552,128)
    bslab = jnp.concatenate(
        [zero_forget(p["b0"]), zero_forget(p["b1"]), b14, b25, b3, regmask,
         jnp.zeros((2, LANES), jnp.float32)], axis=0)                       # (8,128)
    assert wslab.shape == (WSLAB_ROWS, LANES)
    assert bslab.shape == (BSLAB_ROWS, LANES)
    return wslab, bslab


# ------------------------------ pure-JAX reference ------------------------------
def reference_forward(x, p):
    """Unfused / unpacked reference (validates packing, fusion, and layout)."""
    B, S, D = x.shape
    H = LSTM_HIDDEN
    xf = x.reshape(B * S, D)

    def step(inp, w, b):
        g = inp @ w + b
        i_g = jax.nn.sigmoid(g[:, 0 * H:1 * H])
        g_g = jnp.tanh(g[:, 2 * H:3 * H])
        o_g = jax.nn.sigmoid(g[:, 3 * H:4 * H])
        return o_g * jnp.tanh(i_g * g_g)

    h = step(xf, p["w0"], p["b0"])
    h = step(h, p["w1"], p["b1"])
    out_total = h.reshape(B, S, H)
    feat = h.reshape(B, S * H)
    c1 = jax.nn.relu(feat @ p["fc1w"] + p["fc1b"])
    c2 = jax.nn.relu(c1 @ p["fc2w"] + p["fc2b"])
    c3 = c2 @ p["fc3w"] + p["fc3b"]
    r1 = jax.nn.relu(feat @ p["fc4w"] + p["fc4b"])
    r2 = r1 @ p["fc5w"] + p["fc5b"]
    return out_total, c3, r2.reshape(B, S, 1)


# ----------------------------------- main --------------------------------------
if __name__ == "__main__":
    key = jax.random.PRNGKey(0)
    k_x, k_p = jax.random.split(key)
    x = jax.random.normal(k_x, (BATCH, SEQ_DIM, INPUT_DIM), jnp.float32)
    params = init_params(k_p)
    wslab, bslab = pack_params(params)

    out_total, out_class3, out_reg3 = jax.block_until_ready(
        lstm_classifier_forward(x, wslab, bslab))

    ref_total, ref_class3, ref_reg3 = reference_forward(x, params)
    np.testing.assert_allclose(np.asarray(out_total), np.asarray(ref_total),
                               rtol=2e-5, atol=2e-5)
    np.testing.assert_allclose(np.asarray(out_class3), np.asarray(ref_class3),
                               rtol=2e-5, atol=2e-5)
    np.testing.assert_allclose(np.asarray(out_reg3), np.asarray(ref_reg3),
                               rtol=2e-5, atol=2e-5)

    assert out_total.shape == (BATCH, SEQ_DIM, LSTM_HIDDEN)
    assert out_class3.shape == (BATCH, L3_CLASS)
    assert out_reg3.shape == (BATCH, SEQ_DIM, 1)
    # TODO(synk): nn.Dropout2d / LSTM inter-layer dropout are training-only;
    # inference semantics (identity) are implemented here.
    print("KERNEL_OK")
</pallas_src>

<mosaic_0001>
module attributes {stable_mosaic.version = 11 : i64} {
  func.func @_lstm_classifier_kernel(%arg0: i32, %arg1: memref<64x8xf32, #tpu.memory_space<vmem>>, %arg2: memref<552x128xf32, #tpu.memory_space<vmem>>, %arg3: memref<8x128xf32, #tpu.memory_space<vmem>>, %arg4: memref<8x256xf32, #tpu.memory_space<vmem>>, %arg5: memref<8x128xf32, #tpu.memory_space<vmem>>) attributes {dimension_semantics = [#tpu.dimension_semantics<arbitrary>], iteration_bounds = array<i64: 1>, scalar_prefetch = 0 : i64, scratch_operands = 0 : i64, tpu.core_type = #tpu.core_type<tc>, window_params = [{pipeline_mode = #tpu.pipeline_mode<synchronous>, transform_indices = @transform_0, window_bounds = array<i64: 64, 8>}, {pipeline_mode = #tpu.pipeline_mode<synchronous>, transform_indices = @transform_1, window_bounds = array<i64: 552, 128>}, {pipeline_mode = #tpu.pipeline_mode<synchronous>, transform_indices = @transform_2, window_bounds = array<i64: 8, 128>}, {pipeline_mode = #tpu.pipeline_mode<synchronous>, transform_indices = @transform_3, window_bounds = array<i64: 8, 256>}, {pipeline_mode = #tpu.pipeline_mode<synchronous>, transform_indices = @transform_4, window_bounds = array<i64: 8, 128>}]} {
    %c0 = arith.constant 0 : index
    %c0_0 = arith.constant 0 : index
    %0 = vector.load %arg1[%c0, %c0_0] : memref<64x8xf32, #tpu.memory_space<vmem>>, vector<64x8xf32>
    %c0_1 = arith.constant 0 : index
    %c0_2 = arith.constant 0 : index
    %1 = vector.load %arg2[%c0_1, %c0_2] : memref<552x128xf32, #tpu.memory_space<vmem>>, vector<8x128xf32>
    %c0_3 = arith.constant 0 : index
    %c0_4 = arith.constant 0 : index
    %2 = vector.load %arg3[%c0_3, %c0_4] : memref<8x128xf32, #tpu.memory_space<vmem>>, vector<1x128xf32>
    %cst = arith.constant dense<0.000000e+00> : vector<64x128xf32>
    %3 = tpu.matmul %0, %1, %cst {dimension_numbers = #tpu.dot_dimension_numbers<[1], [0], [0], [1], [0, 0, 1, 1], [], []>} : vector<64x8xf32>, vector<8x128xf32>, vector<64x128xf32> -> vector<64x128xf32>
    %4 = vector.broadcast %2 : vector<1x128xf32> to vector<64x128xf32>
    %5 = arith.addf %3, %4 : vector<64x128xf32>
    %6 = arith.negf %5 : vector<64x128xf32>
    %7 = math.exp %6 : vector<64x128xf32>
    %cst_5 = arith.constant 1.000000e+00 : f32
    %8 = vector.broadcast %cst_5 : f32 to vector<64x128xf32>
    %9 = arith.addf %8, %7 : vector<64x128xf32>
    %10 = arith.divf %8, %9 : vector<64x128xf32>
    %11 = math.tanh %5 : vector<64x128xf32>
    %12 = vector.extract_strided_slice %10 {offsets = [0, 0], sizes = [64, 32], strides = [1, 1]} : vector<64x128xf32> to vector<64x32xf32>
    %13 = vector.extract_strided_slice %11 {offsets = [0, 64], sizes = [64, 32], strides = [1, 1]} : vector<64x128xf32> to vector<64x32xf32>
    %14 = vector.extract_strided_slice %10 {offsets = [0, 96], sizes = [64, 32], strides = [1, 1]} : vector<64x128xf32> to vector<64x32xf32>
    %15 = arith.mulf %12, %13 : vector<64x32xf32>
    %16 = math.tanh %15 : vector<64x32xf32>
    %17 = arith.mulf %14, %16 : vector<64x32xf32>
    %c8 = arith.constant 8 : index
    %c0_6 = arith.constant 0 : index
    %18 = vector.load %arg2[%c8, %c0_6] : memref<552x128xf32, #tpu.memory_space<vmem>>, vector<32x128xf32>
    %c1 = arith.constant 1 : index
    %c0_7 = arith.constant 0 : index
    %19 = vector.load %arg3[%c1, %c0_7] : memref<8x128xf32, #tpu.memory_space<vmem>>, vector<1x128xf32>
    %cst_8 = arith.constant dense<0.000000e+00> : vector<64x128xf32>
    %20 = tpu.matmul %17, %18, %cst_8 {dimension_numbers = #tpu.dot_dimension_numbers<[1], [0], [0], [1], [0, 0, 1, 1], [], []>} : vector<64x32xf32>, vector<32x128xf32>, vector<64x128xf32> -> vector<64x128xf32>
    %21 = vector.broadcast %19 : vector<1x128xf32> to vector<64x128xf32>
    %22 = arith.addf %20, %21 : vector<64x128xf32>
    %23 = arith.negf %22 : vector<64x128xf32>
    %24 = math.exp %23 : vector<64x128xf32>
    %cst_9 = arith.constant 1.000000e+00 : f32
    %25 = vector.broadcast %cst_9 : f32 to vector<64x128xf32>
    %26 = arith.addf %25, %24 : vector<64x128xf32>
    %27 = arith.divf %25, %26 : vector<64x128xf32>
    %28 = math.tanh %22 : vector<64x128xf32>
    %29 = vector.extract_strided_slice %27 {offsets = [0, 0], sizes = [64, 32], strides = [1, 1]} : vector<64x128xf32> to vector<64x32xf32>
    %30 = vector.extract_strided_slice %28 {offsets = [0, 64], sizes = [64, 32], strides = [1, 1]} : vector<64x128xf32> to vector<64x32xf32>
    %31 = vector.extract_strided_slice %27 {offsets = [0, 96], sizes = [64, 32], strides = [1, 1]} : vector<64x128xf32> to vector<64x32xf32>
    %32 = arith.mulf %29, %30 : vector<64x32xf32>
    %33 = math.tanh %32 : vector<64x32xf32>
    %34 = arith.mulf %31, %33 : vector<64x32xf32>
    %cst_10 = arith.constant 0.000000e+00 : f32
    %35 = vector.broadcast %cst_10 : f32 to vector<8x128xf32>
    %36 = vector.extract_strided_slice %34 {offsets = [0, 0], sizes = [8, 32], strides = [1, 1]} : vector<64x32xf32> to vector<8x32xf32>
    %c0_11 = arith.constant 0 : index
    %c0_12 = arith.constant 0 : index
    %37 = vector.load %arg4[%c0_11, %c0_12] : memref<8x256xf32, #tpu.memory_space<vmem>>, vector<8x32xf32>
    tpu.vector_store %arg4[%c0_11, %c0_12], %36 {strides = array<i32>} : memref<8x256xf32, #tpu.memory_space<vmem>>, vector<8x32xf32>,
    %c40 = arith.constant 40 : index
    %c0_13 = arith.constant 0 : index
    %38 = vector.load %arg2[%c40, %c0_13] : memref<552x128xf32, #tpu.memory_space<vmem>>, vector<32x128xf32>
    %cst_14 = arith.constant dense<0.000000e+00> : vector<8x128xf32>
    %39 = tpu.matmul %36, %38, %cst_14 {dimension_numbers = #tpu.dot_dimension_numbers<[1], [0], [0], [1], [0, 0, 1, 1], [], []>} : vector<8x32xf32>, vector<32x128xf32>, vector<8x128xf32> -> vector<8x128xf32>
    %40 = arith.addf %35, %39 : vector<8x128xf32>
    %41 = vector.extract_strided_slice %34 {offsets = [8, 0], sizes = [8, 32], strides = [1, 1]} : vector<64x32xf32> to vector<8x32xf32>
    %c0_15 = arith.constant 0 : index
    %c32 = arith.constant 32 : index
    %42 = vector.load %arg4[%c0_15, %c32] : memref<8x256xf32, #tpu.memory_space<vmem>>, vector<8x32xf32>
    tpu.vector_store %arg4[%c0_15, %c32], %41 {strides = array<i32>} : memref<8x256xf32, #tpu.memory_space<vmem>>, vector<8x32xf32>,
    %c72 = arith.constant 72 : index
    %c0_16 = arith.constant 0 : index
    %43 = vector.load %arg2[%c72, %c0_16] : memref<552x128xf32, #tpu.memory_space<vmem>>, vector<32x128xf32>
    %cst_17 = arith.constant dense<0.000000e+00> : vector<8x128xf32>
    %44 = tpu.matmul %41, %43, %cst_17 {dimension_numbers = #tpu.dot_dimension_numbers<[1], [0], [0], [1], [0, 0, 1, 1], [], []>} : vector<8x32xf32>, vector<32x128xf32>, vector<8x128xf32> -> vector<8x128xf32>
    %45 = arith.addf %40, %44 : vector<8x128xf32>
    %46 = vector.extract_strided_slice %34 {offsets = [16, 0], sizes = [8, 32], strides = [1, 1]} : vector<64x32xf32> to vector<8x32xf32>
    %c0_18 = arith.constant 0 : index
    %c64 = arith.constant 64 : index
    %47 = vector.load %arg4[%c0_18, %c64] : memref<8x256xf32, #tpu.memory_space<vmem>>, vector<8x32xf32>
    tpu.vector_store %arg4[%c0_18, %c64], %46 {strides = array<i32>} : memref<8x256xf32, #tpu.memory_space<vmem>>, vector<8x32xf32>,
    %c104 = arith.constant 104 : index
    %c0_19 = arith.constant 0 : index
    %48 = vector.load %arg2[%c104, %c0_19] : memref<552x128xf32, #tpu.memory_space<vmem>>, vector<32x128xf32>
    %cst_20 = arith.constant dense<0.000000e+00> : vector<8x128xf32>
    %49 = tpu.matmul %46, %48, %cst_20 {dimension_numbers = #tpu.dot_dimension_numbers<[1], [0], [0], [1], [0, 0, 1, 1], [], []>} : vector<8x32xf32>, vector<32x128xf32>, vector<8x128xf32> -> vector<8x128xf32>
    %50 = arith.addf %45, %49 : vector<8x128xf32>
    %51 = vector.extract_strided_slice %34 {offsets = [24, 0], sizes = [8, 32], strides = [1, 1]} : vector<64x32xf32> to vector<8x32xf32>
    %c0_21 = arith.constant 0 : index
    %c96 = arith.constant 96 : index
    %52 = vector.load %arg4[%c0_21, %c96] : memref<8x256xf32, #tpu.memory_space<vmem>>, vector<8x32xf32>
    tpu.vector_store %arg4[%c0_21, %c96], %51 {strides = array<i32>} : memref<8x256xf32, #tpu.memory_space<vmem>>, vector<8x32xf32>,
    %c136 = arith.constant 136 : index
    %c0_22 = arith.constant 0 : index
    %53 = vector.load %arg2[%c136, %c0_22] : memref<552x128xf32, #tpu.memory_space<vmem>>, vector<32x128xf32>
    %cst_23 = arith.constant dense<0.000000e+00> : vector<8x128xf32>
    %54 = tpu.matmul %51, %53, %cst_23 {dimension_numbers = #tpu.dot_dimension_numbers<[1], [0], [0], [1], [0, 0, 1, 1], [], []>} : vector<8x32xf32>, vector<32x128xf32>, vector<8x128xf32> -> vector<8x128xf32>
    %55 = arith.addf %50, %54 : vector<8x128xf32>
    %56 = vector.extract_strided_slice %34 {offsets = [32, 0], sizes = [8, 32], strides = [1, 1]} : vector<64x32xf32> to vector<8x32xf32>
    %c0_24 = arith.constant 0 : index
    %c128 = arith.constant 128 : index
    %57 = vector.load %arg4[%c0_24, %c128] : memref<8x256xf32, #tpu.memory_space<vmem>>, vector<8x32xf32>
    tpu.vector_store %arg4[%c0_24, %c128], %56 {strides = array<i32>} : memref<8x256xf32, #tpu.memory_space<vmem>>, vector<8x32xf32>,
    %c168 = arith.constant 168 : index
    %c0_25 = arith.constant 0 : index
    %58 = vector.load %arg2[%c168, %c0_25] : memref<552x128xf32, #tpu.memory_space<vmem>>, vector<32x128xf32>
    %cst_26 = arith.constant dense<0.000000e+00> : vector<8x128xf32>
    %59 = tpu.matmul %56, %58, %cst_26 {dimension_numbers = #tpu.dot_dimension_numbers<[1], [0], [0], [1], [0, 0, 1, 1], [], []>} : vector<8x32xf32>, vector<32x128xf32>, vector<8x128xf32> -> vector<8x128xf32>
    %60 = arith.addf %55, %59 : vector<8x128xf32>
    %61 = vector.extract_strided_slice %34 {offsets = [40, 0], sizes = [8, 32], strides = [1, 1]} : vector<64x32xf32> to vector<8x32xf32>
    %c0_27 = arith.constant 0 : index
    %c160 = arith.constant 160 : index
    %62 = vector.load %arg4[%c0_27, %c160] : memref<8x256xf32, #tpu.memory_space<vmem>>, vector<8x32xf32>
    tpu.vector_store %arg4[%c0_27, %c160], %61 {strides = array<i32>} : memref<8x256xf32, #tpu.memory_space<vmem>>, vector<8x32xf32>,
    %c200 = arith.constant 200 : index
    %c0_28 = arith.constant 0 : index
    %63 = vector.load %arg2[%c200, %c0_28] : memref<552x128xf32, #tpu.memory_space<vmem>>, vector<32x128xf32>
    %cst_29 = arith.constant dense<0.000000e+00> : vector<8x128xf32>
    %64 = tpu.matmul %61, %63, %cst_29 {dimension_numbers = #tpu.dot_dimension_numbers<[1], [0], [0], [1], [0, 0, 1, 1], [], []>} : vector<8x32xf32>, vector<32x128xf32>, vector<8x128xf32> -> vector<8x128xf32>
    %65 = arith.addf %60, %64 : vector<8x128xf32>
    %66 = vector.extract_strided_slice %34 {offsets = [48, 0], sizes = [8, 32], strides = [1, 1]} : vector<64x32xf32> to vector<8x32xf32>
    %c0_30 = arith.constant 0 : index
    %c192 = arith.constant 192 : index
    %67 = vector.load %arg4[%c0_30, %c192] : memref<8x256xf32, #tpu.memory_space<vmem>>, vector<8x32xf32>
    tpu.vector_store %arg4[%c0_30, %c192], %66 {strides = array<i32>} : memref<8x256xf32, #tpu.memory_space<vmem>>, vector<8x32xf32>,
    %c232 = arith.constant 232 : index
    %c0_31 = arith.constant 0 : index
    %68 = vector.load %arg2[%c232, %c0_31] : memref<552x128xf32, #tpu.memory_space<vmem>>, vector<32x128xf32>
    %cst_32 = arith.constant dense<0.000000e+00> : vector<8x128xf32>
    %69 = tpu.matmul %66, %68, %cst_32 {dimension_numbers = #tpu.dot_dimension_numbers<[1], [0], [0], [1], [0, 0, 1, 1], [], []>} : vector<8x32xf32>, vector<32x128xf32>, vector<8x128xf32> -> vector<8x128xf32>
    %70 = arith.addf %65, %69 : vector<8x128xf32>
    %71 = vector.extract_strided_slice %34 {offsets = [56, 0], sizes = [8, 32], strides = [1, 1]} : vector<64x32xf32> to vector<8x32xf32>
    %c0_33 = arith.constant 0 : index
    %c224 = arith.constant 224 : index
    %72 = vector.load %arg4[%c0_33, %c224] : memref<8x256xf32, #tpu.memory_space<vmem>>, vector<8x32xf32>
    tpu.vector_store %arg4[%c0_33, %c224], %71 {strides = array<i32>} : memref<8x256xf32, #tpu.memory_space<vmem>>, vector<8x32xf32>,
    %c264 = arith.constant 264 : index
    %c0_34 = arith.constant 0 : index
    %73 = vector.load %arg2[%c264, %c0_34] : memref<552x128xf32, #tpu.memory_space<vmem>>, vector<32x128xf32>
    %cst_35 = arith.constant dense<0.000000e+00> : vector<8x128xf32>
    %74 = tpu.matmul %71, %73, %cst_35 {dimension_numbers = #tpu.dot_dimension_numbers<[1], [0], [0], [1], [0, 0, 1, 1], [], []>} : vector<8x32xf32>, vector<32x128xf32>, vector<8x128xf32> -> vector<8x128xf32>
    %75 = arith.addf %70, %74 : vector<8x128xf32>
    %c2 = arith.constant 2 : index
    %c0_36 = arith.constant 0 : index
    %76 = vector.load %arg3[%c2, %c0_36] : memref<8x128xf32, #tpu.memory_space<vmem>>, vector<1x128xf32>
    %77 = vector.broadcast %76 : vector<1x128xf32> to vector<8x128xf32>
    %78 = arith.addf %75, %77 : vector<8x128xf32>
    %cst_37 = arith.constant 0.000000e+00 : f32
    %79 = vector.broadcast %cst_37 : f32 to vector<8x128xf32>
    %80 = arith.maximumf %78, %79 : vector<8x128xf32>
    %c296 = arith.constant 296 : index
    %c0_38 = arith.constant 0 : index
    %81 = vector.load %arg2[%c296, %c0_38] : memref<552x128xf32, #tpu.memory_space<vmem>>, vector<128x128xf32>
    %cst_39 = arith.constant dense<0.000000e+00> : vector<8x128xf32>
    %82 = tpu.matmul %80, %81, %cst_39 {dimension_numbers = #tpu.dot_dimension_numbers<[1], [0], [0], [1], [0, 0, 1, 1], [], []>} : vector<8x128xf32>, vector<128x128xf32>, vector<8x128xf32> -> vector<8x128xf32>
    %c3 = arith.constant 3 : index
    %c0_40 = arith.constant 0 : index
    %83 = vector.load %arg3[%c3, %c0_40] : memref<8x128xf32, #tpu.memory_space<vmem>>, vector<1x128xf32>
    %84 = vector.broadcast %83 : vector<1x128xf32> to vector<8x128xf32>
    %85 = arith.addf %82, %84 : vector<8x128xf32>
    %cst_41 = arith.constant 0.000000e+00 : f32
    %86 = vector.broadcast %cst_41 : f32 to vector<8x128xf32>
    %87 = arith.maximumf %85, %86 : vector<8x128xf32>
    %c424 = arith.constant 424 : index
    %c0_42 = arith.constant 0 : index
    %88 = vector.load %arg2[%c424, %c0_42] : memref<552x128xf32, #tpu.memory_space<vmem>>, vector<128x128xf32>
    %cst_43 = arith.constant dense<0.000000e+00> : vector<8x128xf32>
    %89 = tpu.matmul %87, %88, %cst_43 {dimension_numbers = #tpu.dot_dimension_numbers<[1], [0], [0], [1], [0, 0, 1, 1], [], []>} : vector<8x128xf32>, vector<128x128xf32>, vector<8x128xf32> -> vector<8x128xf32>
    %c4 = arith.constant 4 : index
    %c0_44 = arith.constant 0 : index
    %90 = vector.load %arg3[%c4, %c0_44] : memref<8x128xf32, #tpu.memory_space<vmem>>, vector<1x128xf32>
    %91 = vector.broadcast %90 : vector<1x128xf32> to vector<8x128xf32>
    %92 = arith.addf %89, %91 : vector<8x128xf32>
    %c5 = arith.constant 5 : index
    %c0_45 = arith.constant 0 : index
    %93 = vector.load %arg3[%c5, %c0_45] : memref<8x128xf32, #tpu.memory_space<vmem>>, vector<1x128xf32>
    %94 = vector.broadcast %93 : vector<1x128xf32> to vector<8x128xf32>
    %95 = arith.mulf %85, %94 : vector<8x128xf32>
    %96 = arith.addf %92, %95 : vector<8x128xf32>
    %c0_46 = arith.constant 0 : index
    %c0_47 = arith.constant 0 : index
    %97 = vector.load %arg5[%c0_46, %c0_47] : memref<8x128xf32, #tpu.memory_space<vmem>>, vector<8x128xf32>
    tpu.vector_store %arg5[%c0_46, %c0_47], %96 {strides = array<i32>} : memref<8x128xf32, #tpu.memory_space<vmem>>, vector<8x128xf32>,
    return
  }
  func.func @transform_0(%arg0: i32) -> (i32, i32) {
    %c0_i32 = arith.constant 0 : i32
    %c0_i32_0 = arith.constant 0 : i32
    %c0_i32_1 = arith.constant 0 : i32
    return %c0_i32, %c0_i32_0 : i32, i32
  }
  func.func @transform_1(%arg0: i32) -> (i32, i32) {
    %c0_i32 = arith.constant 0 : i32
    %c0_i32_0 = arith.constant 0 : i32
    %c0_i32_1 = arith.constant 0 : i32
    return %c0_i32, %c0_i32_0 : i32, i32
  }
  func.func @transform_2(%arg0: i32) -> (i32, i32) {
    %c0_i32 = arith.constant 0 : i32
    %c0_i32_0 = arith.constant 0 : i32
    %c0_i32_1 = arith.constant 0 : i32
    return %c0_i32, %c0_i32_0 : i32, i32
  }
  func.func @transform_3(%arg0: i32) -> (i32, i32) {
    %c0_i32 = arith.constant 0 : i32
    %c0_i32_0 = arith.constant 0 : i32
    %c0_i32_1 = arith.constant 0 : i32
    return %c0_i32, %c0_i32_0 : i32, i32
  }
  func.func @transform_4(%arg0: i32) -> (i32, i32) {
    %c0_i32 = arith.constant 0 : i32
    %c0_i32_0 = arith.constant 0 : i32
    %c0_i32_1 = arith.constant 0 : i32
    return %c0_i32, %c0_i32_0 : i32, i32
  }
}

</mosaic_0001>

<bundles_post_ra>
// kernel: tpu_custom_call.1
= control target key start
LH: loop header
LB: loop body
LE: loop exit
PB: predicated region body
PF: predicated region fallthrough
CT: control target
= control target key end

     0   :  { %10 = vsyncpa [#allocation3], 0  ;;  %s2348_s0 = inlined_call_operand.vmem [shape: f32[64,8], index: 0, kind: input, shape index: {}]   ;;  %s2349_s1 = inlined_call_operand.hbm [shape: f32[552,128], index: 1, kind: input, shape index: {}]   ;;  %s2350_s2 = inlined_call_operand.vmem [shape: f32[8,128], index: 2, kind: input, shape index: {}]   ;;  %s2351_s3 = inlined_call_operand.hbm [shape: f32[8,256], index: 3, kind: output, shape index: {0}]   ;;  %s2352_s4 = inlined_call_operand.hbm [shape: f32[8,128], index: 4, kind: output, shape index: {1}]  }
   0x1   :  { %11 = vsyncpa [#allocation4], 0 }
   0x2   :  { %12 = vsyncpa [#allocation7], 0  ;;  %s2046_s15 = smov [#allocation2]  }
   0x3   :  { %s20_s16 = sshll.u32 %s2046_s15, 4  ;;  %s21_s16 = int_to_ptr.vmem [resolvable:$true] %s20_s16 }
   0x4   :  { %s1988_s17 = scalar_lea.vmem %s21_s16, 8832  ;;  %p1993_p1 = scmp.lt.s32.totalorder %s21_s16, %s21_s16 }
   0x5   :  { %p1989_p0 = scmp.ne.s32.totalorder %s21_s16, %s1988_s17  ;;  %p1994_p2 = scmp.lt.s32.totalorder %s1988_s17, %s1988_s17 }
   0x7   :  { %p1995_p3 = por %p1994_p2, %p1993_p1 }
   0x9   :  { %p1996_p4 = pnand %p1995_p3, %p1989_p0 }
   0xb   :  { %1999 = shalt.err (!%p1996_p4)
}
   0xc   :  { %s2047_s18 = smov 128   ;;  %s2048_s19 = smov 8  }
   0xd   :  { %26 = dma.hbm_to_vmem [thread:$0]  %s2349_s1, 8832, %s21_s16, [#allocation3], %s2047_s18, %s2047_s18, %s2048_s19  }
   0xe   :  { %2040 = dma.done.wait [#allocation3], 8832  }
   0xf   :  { %2041 = vsyncadd [#allocation3], 4294958464  ;;  %vm46_vm0 = vcmask 64512   ;;  %v40_v0 = vld [vmem:[#allocation2] sm:$0xff]  ;;  %v33_v2 = vld [vmem:[%s2348_s0 + $0x8] sm:$0xff]  ;;  %s2050_s13 = smov 96  }
  0x10   :  { %v32_v1 = vld [vmem:[%s2348_s0] sm:$0xff]  ;;  %1650 = vmatprep.subr.mxu0 %v40_v0  ;;  %v34_v3 = vld [vmem:[%s2348_s0 + $0x10] sm:$0xff]  ;;  %v35_v4 = vld [vmem:[%s2348_s0 + $0x18] sm:$0xff]  ;;  %s2051_s14 = smov 32   ;;  %vm353_vm1 = vcmask 261120   ;;  %vm2053_vm2 = vmmov 0  }
  0x11   :  { %1652 = vmatprep.mubr.msk.f32.mxu0 %vm46_vm0, %v32_v1  ;;  %1651 = vmatpush3.msra.mxu0 %v40_v0  ;;  %v36_v5 = vld [vmem:[%s2348_s0 + $0x20] sm:$0xff]  ;;  %v37_v6 = vld [vmem:[%s2348_s0 + $0x28] sm:$0xff]  ;;  %v38_v7 = vld [vmem:[%s2348_s0 + $0x30] sm:$0xff]  ;;  %vm632_vm3 = vcmask 523520   ;;  %vm788_vm4 = vcmask 785920   ;;  %vm869_vm5 = vcmask 1048320  }
  0x12   :  { %1653 = vmatmul.mubr.msk.f32.vlgmr.msra.gmra.mxu0 %vm46_vm0, %v33_v2  ;;  %v39_v8 = vld [vmem:[%s2348_s0 + $0x38] sm:$0xff]  ;;  %v1509_v10 = vld [vmem:[%s2350_s2] ss:$0 sm:$0xff]  ;;  %s2049_s0 = smov 64   ;;  %s2054_s21 = smov [#allocation5]  }
  0x13   :  { %1655 = vmatprep.mubr.msk.f32.mxu0 %vm46_vm0, %v34_v3  ;;  %s1486_s22 = sshll.u32 %s2054_s21, 4  ;;  %s1487_s22 = int_to_ptr.vmem [resolvable:$true] %s1486_s22 }
  0x14   :  { %s2000_s23 = scalar_lea.vmem %s1487_s22, 256  ;;  %p2005_p6 = scmp.lt.s32.totalorder %s1487_s22, %s1487_s22 }
  0x15   :  { %p2001_p5 = scmp.ne.s32.totalorder %s1487_s22, %s2000_s23  ;;  %p2006_p7 = scmp.lt.s32.totalorder %s2000_s23, %s2000_s23 }
  0x16   :  { %1656 = vmatmul.mubr.msk.f32.gmra.mxu0 %vm46_vm0, %v35_v4 }
  0x17   :  { %1658 = vmatprep.mubr.msk.f32.mxu0 %vm46_vm0, %v36_v5  ;;  %p2007_p8 = por %p2006_p7, %p2005_p6 }
  0x19   :  { %p2008_p9 = pnand %p2007_p8, %p2001_p5 }
  0x1a   :  { %1659 = vmatmul.mubr.msk.f32.gmra.mxu0 %vm46_vm0, %v37_v6 }
  0x1b   :  { %1661 = vmatprep.mubr.msk.f32.mxu0 %vm46_vm0, %v38_v7 }
  0x1e   :  { %1662 = vmatmul.mubr.msk.f32.gmra.mxu0 %vm46_vm0, %v39_v8 }
  0xd2   :  { %v1654_v9 = vpop.f32.mrf.mxu0 }
  0xd3   :  { %v143_v14 = vadd.f32 %v1654_v9, %v1509_v10 }
  0xd4   :  { %v137_v11 = vpop.f32.mrf.mxu0 }
  0xd5   :  { %v138_v12 = vadd.f32 %v1509_v10, %v137_v11  ;;  %v1519_v35 = vmul.f32 -1.442695, %v143_v14 }
  0xd6   :  { %v1657_v13 = vpop.f32.mrf.mxu0 }
  0xd7   :  { %1852 = vtanh.f32 %v138_v12  ;;  %v153_v18 = vadd.f32 %v1657_v13, %v1509_v10  ;;  %v1518_v34 = vmul.f32 -1.442695, %v138_v12 }
  0xd8   :  { %v147_v15 = vpop.f32.mrf.mxu0  ;;  %1854 = vtanh.f32 %v143_v14 }
  0xd9   :  { %v148_v16 = vadd.f32 %v1509_v10, %v147_v15  ;;  %v1521_v37 = vmul.f32 -1.442695, %v153_v18 }
  0xda   :  { %v1660_v17 = vpop.f32.mrf.mxu0 }
  0xdb   :  { %1856 = vtanh.f32 %v148_v16  ;;  %v163_v21 = vadd.f32 %v1660_v17, %v1509_v10  ;;  %v1520_v36 = vmul.f32 -1.442695, %v148_v16 }
  0xdc   :  { %v157_v19 = vpop.f32.mrf.mxu0  ;;  %1858 = vtanh.f32 %v153_v18 }
  0xdd   :  { %v158_v20 = vadd.f32 %v1509_v10, %v157_v19  ;;  %v1523_v39 = vmul.f32 -1.442695, %v163_v21 }
  0xde   :  { %v1663_v22 = vpop.f32.mrf.mxu0 }
  0xdf   :  { %1860 = vtanh.f32 %v158_v20  ;;  %v173_v25 = vadd.f32 %v1663_v22, %v1509_v10  ;;  %v1522_v38 = vmul.f32 -1.442695, %v158_v20 }
  0xe0   :  { %v167_v23 = vpop.f32.mrf.mxu0  ;;  %1862 = vtanh.f32 %v163_v21  ;;  %v323_v21 = vld [vmem:[#allocation2 + $0x20] sm:$0xff] }
  0xe1   :  { %v168_v24 = vadd.f32 %v1509_v10, %v167_v23  ;;  %v1525_v41 = vmul.f32 -1.442695, %v173_v25  ;;  %1664 = vmatprep.subr.mxu1 %v323_v21  ;;  %v322_v23 = vld [vmem:[#allocation2 + $0x18] sm:$0xff] }
  0xe2   :  { %1665 = vmatpush3.msra.mxu1 %v323_v21 }
  0xe3   :  { %1864 = vtanh.f32 %v168_v24  ;;  %v1524_v40 = vmul.f32 -1.442695, %v168_v24  ;;  %1666 = vmatprep.subr.mxu1 %v322_v23 }
  0xe4   :  { %v1853_v26 = vpop.eup %1852  ;;  %1866 = vtanh.f32 %v173_v25  ;;  %1667 = vmatpush3.msra.mxu1 %v322_v23 }
  0xe5   :  { %240 = vrot.lane.b32.xlu0 %v1853_v26, %s2049_s0  ;;  %v1855_v27 = vpop.eup %1854  ;;  %1868 = vpow2.f32 %v1518_v34 }
  0xe6   :  { %1870 = vpow2.f32 %v1519_v35 }
  0xe7   :  { %1872 = vpow2.f32 %v1520_v36 }
  0xe8   :  { %v1857_v28 = vpop.eup %1856  ;;  %1874 = vpow2.f32 %v1521_v37 }
  0xe9   :  { %244 = vrot.lane.b32.xlu1 %v1857_v28, %s2049_s0  ;;  %242 = vrot.lane.b32.xlu0 %v1855_v27, %s2049_s0  ;;  %v1859_v29 = vpop.eup %1858  ;;  %1876 = vpow2.f32 %v1522_v38  ;;  %v321_v28 = vld [vmem:[#allocation2 + $0x10] sm:$0xff] }
  0xea   :  { %1878 = vpow2.f32 %v1523_v39  ;;  %1668 = vmatprep.subr.mxu1 %v321_v28 }
  0xeb   :  { %1880 = vpow2.f32 %v1524_v40  ;;  %1669 = vmatpush3.msra.mxu1 %v321_v28 }
  0xec   :  { %v1861_v30 = vpop.eup %1860  ;;  %1882 = vpow2.f32 %v1525_v41 }
  0xed   :  { %246 = vrot.lane.b32.xlu1 %v1859_v29, %s2049_s0  ;;  %248 = vrot.lane.b32.xlu0 %v1861_v30, %s2049_s0  ;;  %v1863_v31 = vpop.eup %1862  ;;  %v320_v29 = vld [vmem:[#allocation2 + $0x8] sm:$0xff] }
  0xee   :  { %1670 = vmatprep.subr.mxu1 %v320_v29 }
  0xef   :  { %1671 = vmatpush3.msra.mxu1 %v320_v29 }
  0xf0   :  { %v1865_v32 = vpop.eup %1864 }
  0xf1   :  { %250 = vrot.lane.b32.xlu1 %v1863_v31, %s2049_s0  ;;  %252 = vrot.lane.b32.xlu0 %v1865_v32, %s2049_s0  ;;  %v1867_v33 = vpop.eup %1866 }
  0xf2   :  { %v1869_v42 = vpop.eup %1868 }
  0xf3   :  { %v1871_v43 = vpop.eup %1870  ;;  %v200_v44 = vadd.f32 1.0, %v1869_v42 }
  0xf4   :  { %v1873_v45 = vpop.eup %1872  ;;  %v201_v46 = vadd.f32 1.0, %v1871_v43 }
  0xf5   :  { %254 = vrot.lane.b32.xlu1 %v1867_v33, %s2049_s0  ;;  %v1875_v47 = vpop.eup %1874  ;;  %1884 = vrcp.f32 %v200_v44  ;;  %v202_v48 = vadd.f32 1.0, %v1873_v45 }
  0xf6   :  { %v1877_v49 = vpop.eup %1876  ;;  %1886 = vrcp.f32 %v201_v46  ;;  %v203_v50 = vadd.f32 1.0, %v1875_v47 }
  0xf7   :  { %v1879_v51 = vpop.eup %1878  ;;  %1888 = vrcp.f32 %v202_v48  ;;  %v204_v52 = vadd.f32 1.0, %v1877_v49 }
  0xf8   :  { %v1881_v53 = vpop.eup %1880  ;;  %1890 = vrcp.f32 %v203_v50  ;;  %v205_v54 = vadd.f32 1.0, %v1879_v51 }
  0xf9   :  { %v1883_v55 = vpop.eup %1882  ;;  %1892 = vrcp.f32 %v204_v52  ;;  %v206_v56 = vadd.f32 1.0, %v1881_v53 }
  0xfa   :  { %1894 = vrcp.f32 %v205_v54  ;;  %v207_v57 = vadd.f32 1.0, %v1883_v55  ;;  %v1526_v54 = vld [vmem:[%s2350_s2 + $0x1] ss:$0 sm:$0xff] }
  0xfb   :  { %1896 = vrcp.f32 %v206_v56 }
  0xfc   :  { %1898 = vrcp.f32 %v207_v57 }
 0x102   :  { %v2127_v58 = vpop.eup %1884 }
 0x103   :  { %v2130_v61 = vpop.eup %1886 }
 0x104   :  { %v1889_v62 = vpop.eup %1888 }
 0x105   :  { %v2133_v3 = vpop.eup %1890 }
 0x106   :  { %v1893_v4 = vpop.eup %1892 }
 0x107   :  { %v1895_v9 = vpop.eup %1894 }
 0x108   :  { %v1897_v10 = vpop.eup %1896 }
 0x109   :  { %v1899_v15 = vpop.eup %1898 }
 0x157   :  { %v241_v59 = vpop.permute.xlu0 %240 }
 0x158   :  { %v264_v60 = vmul.f32 %v2127_v58, %v241_v59 }
 0x15a   :  { %1900 = vtanh.f32 %v264_v60 }
 0x15b   :  { %v245_v63 = vpop.permute.xlu1 %244  ;;  %v243_v0 = vpop.permute.xlu0 %242 }
 0x15c   :  { %v266_v1 = vmul.f32 %v1889_v62, %v245_v63  ;;  %v265_v2 = vmul.f32 %v2130_v61, %v243_v0 }
 0x15e   :  { %1902 = vtanh.f32 %v266_v1 }
 0x15f   :  { %1904 = vtanh.f32 %v265_v2  ;;  %v247_v5 = vpop.permute.xlu1 %246  ;;  %v249_v6 = vpop.permute.xlu0 %248 }
 0x160   :  { %v267_v7 = vmul.f32 %v2133_v3, %v247_v5  ;;  %v268_v8 = vmul.f32 %v1893_v4, %v249_v6 }
 0x162   :  { %1906 = vtanh.f32 %v267_v7 }
 0x163   :  { %1908 = vtanh.f32 %v268_v8  ;;  %v251_v11 = vpop.permute.xlu1 %250  ;;  %v253_v12 = vpop.permute.xlu0 %252 }
 0x164   :  { %v269_v13 = vmul.f32 %v1895_v9, %v251_v11  ;;  %v270_v14 = vmul.f32 %v1897_v10, %v253_v12 }
 0x166   :  { %1910 = vtanh.f32 %v269_v13 }
 0x167   :  { %v1901_v16 = vpop.eup %1900  ;;  %1912 = vtanh.f32 %v270_v14  ;;  %v255_v17 = vpop.permute.xlu1 %254 }
 0x168   :  { %v271_v18 = vmul.f32 %v1899_v15, %v255_v17  ;;  %288 = vrot.lane.b32.xlu0 %v1901_v16, %s2050_s13 }
 0x16a   :  { %1914 = vtanh.f32 %v271_v18 }
 0x16b   :  { %v1903_v19 = vpop.eup %1902 }
 0x16c   :  { %v1905_v20 = vpop.eup %1904  ;;  %292 = vrot.lane.b32.xlu0 %v1903_v19, %s2050_s13 }
 0x16d   :  { %290 = vrot.lane.b32.xlu1 %v1905_v20, %s2050_s13 }
 0x16f   :  { %v1907_v22 = vpop.eup %1906 }
 0x170   :  { %v1909_v24 = vpop.eup %1908 }
 0x171   :  { %294 = vrot.lane.b32.xlu1 %v1907_v22, %s2050_s13  ;;  %296 = vrot.lane.b32.xlu0 %v1909_v24, %s2050_s13 }
 0x173   :  { %v1911_v25 = vpop.eup %1910 }
 0x174   :  { %v1913_v26 = vpop.eup %1912 }
 0x175   :  { %298 = vrot.lane.b32.xlu1 %v1911_v25, %s2050_s13  ;;  %300 = vrot.lane.b32.xlu0 %v1913_v26, %s2050_s13 }
 0x177   :  { %v1915_v27 = vpop.eup %1914 }
 0x179   :  { %302 = vrot.lane.b32.xlu1 %v1915_v27, %s2050_s13 }
 0x1da   :  { %v289_v30 = vpop.permute.xlu0 %288 }
 0x1db   :  { %v312_v31 = vmul.f32 %v2127_v58, %v289_v30 }
 0x1dd   :  { %337 = vrot.lane.b32.xlu0 %v312_v31, %s2051_s14 }
 0x1de   :  { %v293_v32 = vpop.permute.xlu0 %292 }
 0x1df   :  { %v291_v33 = vpop.permute.xlu1 %290  ;;  %v314_v34 = vmul.f32 %v1889_v62, %v293_v32 }
 0x1e0   :  { %v313_v35 = vmul.f32 %v2130_v61, %v291_v33 }
 0x1e1   :  { %341 = vrot.lane.b32.xlu0 %v314_v34, %s2051_s14 }
 0x1e2   :  { %339 = vrot.lane.b32.xlu1 %v313_v35, %s2051_s14 }
 0x1e3   :  { %v295_v36 = vpop.permute.xlu1 %294  ;;  %v297_v37 = vpop.permute.xlu0 %296 }
 0x1e4   :  { %v315_v38 = vmul.f32 %v2133_v3, %v295_v36  ;;  %v316_v39 = vmul.f32 %v1893_v4, %v297_v37 }
 0x1e6   :  { %343 = vrot.lane.b32.xlu1 %v315_v38, %s2051_s14  ;;  %345 = vrot.lane.b32.xlu0 %v316_v39, %s2051_s14 }
 0x1e7   :  { %v299_v40 = vpop.permute.xlu1 %298  ;;  %v301_v41 = vpop.permute.xlu0 %300 }
 0x1e8   :  { %v317_v42 = vmul.f32 %v1895_v9, %v299_v40  ;;  %v318_v43 = vmul.f32 %v1897_v10, %v301_v41 }
 0x1ea   :  { %347 = vrot.lane.b32.xlu1 %v317_v42, %s2051_s14  ;;  %349 = vrot.lane.b32.xlu0 %v318_v43, %s2051_s14 }
 0x1eb   :  { %v303_v44 = vpop.permute.xlu1 %302 }
 0x1ec   :  { %v319_v45 = vmul.f32 %v1899_v15, %v303_v44 }
 0x1ee   :  { %351 = vrot.lane.b32.xlu1 %v319_v45, %s2051_s14 }
 0x24f   :  { %v338_v46 = vpop.permute.xlu0 %337 }
 0x250   :  { %1672 = vmatprep.mubr.msk.f32.mxu1 %vm353_vm1, %v338_v46 }
 0x253   :  { %v342_v47 = vpop.permute.xlu0 %341 }
 0x254   :  { %v340_v48 = vpop.permute.xlu1 %339 }
 0x255   :  { %1673 = vmatmul.mubr.msk.f32.vlgmr.msra.gmra.mxu1 %vm353_vm1, %v340_v48 }
 0x256   :  { %1675 = vmatprep.mubr.msk.f32.mxu1 %vm353_vm1, %v342_v47 }
 0x258   :  { %v344_v49 = vpop.permute.xlu1 %343  ;;  %v346_v50 = vpop.permute.xlu0 %345 }
 0x259   :  { %1676 = vmatmul.mubr.msk.f32.gmra.mxu1 %vm353_vm1, %v344_v49 }
 0x25a   :  { %1678 = vmatprep.mubr.msk.f32.mxu1 %vm353_vm1, %v346_v50 }
 0x25c   :  { %v348_v51 = vpop.permute.xlu1 %347  ;;  %v350_v52 = vpop.permute.xlu0 %349 }
 0x25d   :  { %1679 = vmatmul.mubr.msk.f32.gmra.mxu1 %vm353_vm1, %v348_v51 }
 0x25e   :  { %1681 = vmatprep.mubr.msk.f32.mxu1 %vm353_vm1, %v350_v52 }
 0x260   :  { %v352_v53 = vpop.permute.xlu1 %351 }
 0x261   :  { %1682 = vmatmul.mubr.msk.f32.gmra.mxu1 %vm353_vm1, %v352_v53 }
 0x315   :  { %v1674_v55 = vpop.f32.mrf.mxu1 }
 0x316   :  { %v442_v56 = vadd.f32 %v1674_v55, %v1526_v54 }
 0x317   :  { %v436_v57 = vpop.f32.mrf.mxu1 }
 0x318   :  { %1916 = vtanh.f32 %v442_v56  ;;  %v437_v58 = vadd.f32 %v1526_v54, %v436_v57  ;;  %v1536_v15 = vmul.f32 -1.442695, %v442_v56 }
 0x319   :  { %v1677_v59 = vpop.f32.mrf.mxu1 }
 0x31a   :  { %v452_v60 = vadd.f32 %v1677_v59, %v1526_v54  ;;  %1918 = vtanh.f32 %v437_v58  ;;  %v1535_v16 = vmul.f32 -1.442695, %v437_v58 }
 0x31b   :  { %v446_v61 = vpop.f32.mrf.mxu1 }
 0x31c   :  { %v447_v62 = vadd.f32 %v1526_v54, %v446_v61  ;;  %1920 = vtanh.f32 %v452_v60  ;;  %v1538_v17 = vmul.f32 -1.442695, %v452_v60 }
 0x31d   :  { %v1680_v63 = vpop.f32.mrf.mxu1 }
 0x31e   :  { %v462_v0 = vadd.f32 %v1680_v63, %v1526_v54  ;;  %1922 = vtanh.f32 %v447_v62  ;;  %v1537_v18 = vmul.f32 -1.442695, %v447_v62 }
 0x31f   :  { %v456_v1 = vpop.f32.mrf.mxu1 }
 0x320   :  { %v457_v2 = vadd.f32 %v1526_v54, %v456_v1  ;;  %1924 = vtanh.f32 %v462_v0  ;;  %v1540_v19 = vmul.f32 -1.442695, %v462_v0 }
 0x321   :  { %v1683_v3 = vpop.f32.mrf.mxu1 }
 0x322   :  { %v472_v4 = vadd.f32 %v1683_v3, %v1526_v54  ;;  %1926 = vtanh.f32 %v457_v2  ;;  %v1539_v20 = vmul.f32 -1.442695, %v457_v2 }
 0x323   :  { %v466_v5 = vpop.f32.mrf.mxu1 }
 0x324   :  { %v467_v6 = vadd.f32 %v1526_v54, %v466_v5  ;;  %1928 = vtanh.f32 %v472_v4  ;;  %v1542_v21 = vmul.f32 -1.442695, %v472_v4  ;;  %v637_v5 = vld [vmem:[#allocation2 + $0x60] sm:$0xff] }
 0x325   :  { %v1917_v7 = vpop.eup %1916 }
 0x326   :  { %541 = vrot.lane.b32.xlu0 %v1917_v7, %s2049_s0  ;;  %1930 = vtanh.f32 %v467_v6  ;;  %v1541_v22 = vmul.f32 -1.442695, %v467_v6  ;;  %v627_v6 = vld [vmem:[#allocation2 + $0x40] sm:$0xff] }
 0x327   :  { %v1919_v8 = vpop.eup %1918  ;;  %1932 = vpow2.f32 %v1536_v15  ;;  %v624_v15 = vld [vmem:[#allocation2 + $0x28] sm:$0xff] }
 0x328   :  { %539 = vrot.lane.b32.xlu1 %v1919_v8, %s2049_s0  ;;  %1934 = vpow2.f32 %v1535_v16  ;;  %v2052_v8 = vmov 0.0  }
 0x329   :  { %v1921_v9 = vpop.eup %1920  ;;  %1936 = vpow2.f32 %v1538_v17  ;;  %1684 = vmatprep.subr.mxu0 %v2052_v8  ;;  %1695 = vmatprep.subr.mxu1 %v2052_v8 }
 0x32a   :  { %1938 = vpow2.f32 %v1537_v18  ;;  %1685 = vmatpush3.msra.mxu0 %v637_v5  ;;  %1696 = vmatpush3.msra.mxu1 %v627_v6  ;;  %v1303_v5 = vld [vmem:[#allocation2 + $0x198] sm:$0xff]  ;;  %v1302_v6 = vld [vmem:[#allocation2 + $0x190] sm:$0xff] }
 0x32b   :  { %v1923_v10 = vpop.eup %1922  ;;  %1940 = vpow2.f32 %v1540_v19  ;;  %1686 = vmatprep.subr.mxu0 %v2052_v8  ;;  %1697 = vmatprep.subr.mxu1 %v2052_v8 }
 0x32c   :  { %545 = vrot.lane.b32.xlu1 %v1921_v9, %s2049_s0  ;;  %543 = vrot.lane.b32.xlu0 %v1923_v10, %s2049_s0  ;;  %1942 = vpow2.f32 %v1539_v20  ;;  %v636_v10 = vld [vmem:[#allocation2 + $0x58] sm:$0xff] }
 0x32d   :  { %v1925_v11 = vpop.eup %1924  ;;  %1944 = vpow2.f32 %v1542_v21  ;;  %1687 = vmatpush3.msra.mxu0 %v636_v10  ;;  %1692 = vmatprep.mubr.msk.f32.mxu0 %vm2053_vm2, %v2052_v8  ;;  %v1299_v10 = vld [vmem:[#allocation2 + $0x178] sm:$0xff] }
 0x32e   :  { %1946 = vpow2.f32 %v1541_v22  ;;  %1688 = vmatprep.subr.mxu0 %v2052_v8  ;;  %1703 = vmatprep.mubr.msk.f32.mxu1 %vm2053_vm2, %v2052_v8 }
 0x32f   :  { %v1927_v12 = vpop.eup %1926 }
 0x330   :  { %549 = vrot.lane.b32.xlu1 %v1925_v11, %s2049_s0  ;;  %547 = vrot.lane.b32.xlu0 %v1927_v12, %s2049_s0  ;;  %v626_v11 = vld [vmem:[#allocation2 + $0x38] sm:$0xff]  ;;  %v635_v12 = vld [vmem:[#allocation2 + $0x50] sm:$0xff] }
 0x331   :  { %v1929_v13 = vpop.eup %1928  ;;  %1698 = vmatpush3.msra.mxu1 %v626_v11  ;;  %1689 = vmatpush3.msra.mxu0 %v635_v12  ;;  %v1298_v11 = vld [vmem:[#allocation2 + $0x170] sm:$0xff]  ;;  %v1297_v12 = vld [vmem:[#allocation2 + $0x168] sm:$0xff] }
 0x332   :  { %1699 = vmatprep.subr.mxu1 %v2052_v8  ;;  %1690 = vmatprep.subr.mxu0 %v2052_v8 }
 0x333   :  { %v1931_v14 = vpop.eup %1930 }
 0x334   :  { %553 = vrot.lane.b32.xlu1 %v1929_v13, %s2049_s0  ;;  %551 = vrot.lane.b32.xlu0 %v1931_v14, %s2049_s0  ;;  %v1933_v23 = vpop.eup %1932  ;;  %v625_v13 = vld [vmem:[#allocation2 + $0x30] sm:$0xff]  ;;  %v634_v14 = vld [vmem:[#allocation2 + $0x48] sm:$0xff] }
 0x335   :  { %v1935_v24 = vpop.eup %1934  ;;  %v500_v25 = vadd.f32 1.0, %v1933_v23  ;;  %1700 = vmatpush3.msra.mxu1 %v625_v13  ;;  %1691 = vmatpush3.msra.mxu0 %v634_v14  ;;  %v1296_v13 = vld [vmem:[#allocation2 + $0x160] sm:$0xff]  ;;  %v1295_v14 = vld [vmem:[#allocation2 + $0x158] sm:$0xff] }
 0x336   :  { %v1937_v26 = vpop.eup %1936  ;;  %v499_v27 = vadd.f32 1.0, %v1935_v24  ;;  %1701 = vmatprep.subr.mxu1 %v2052_v8  ;;  %1706 = vmatprep.subr.mxu0 %v2052_v8 }
 0x337   :  { %v1939_v28 = vpop.eup %1938  ;;  %1948 = vrcp.f32 %v500_v25  ;;  %v502_v29 = vadd.f32 1.0, %v1937_v26  ;;  %1702 = vmatpush3.msra.mxu1 %v624_v15  ;;  %v1294_v15 = vld [vmem:[#allocation2 + $0x150] sm:$0xff] }
 0x338   :  { %v1941_v30 = vpop.eup %1940  ;;  %1950 = vrcp.f32 %v499_v27  ;;  %v501_v31 = vadd.f32 1.0, %v1939_v28  ;;  %1717 = vmatprep.subr.mxu1 %v2052_v8 }
 0x339   :  { %v1943_v32 = vpop.eup %1942  ;;  %1952 = vrcp.f32 %v502_v29  ;;  %v504_v33 = vadd.f32 1.0, %v1941_v30 }
 0x33a   :  { %v1945_v34 = vpop.eup %1944  ;;  %1954 = vrcp.f32 %v501_v31  ;;  %v503_v35 = vadd.f32 1.0, %v1943_v32  ;;  %v793_v32 = vld [vmem:[#allocation2 + $0x80] sm:$0xff] }
 0x33b   :  { %v1947_v36 = vpop.eup %1946  ;;  %1956 = vrcp.f32 %v504_v33  ;;  %v506_v37 = vadd.f32 1.0, %v1945_v34  ;;  %v792_v34 = vld [vmem:[#allocation2 + $0x78] sm:$0xff] }
 0x33c   :  { %1958 = vrcp.f32 %v503_v35  ;;  %v505_v38 = vadd.f32 1.0, %v1947_v36  ;;  %v874_v35 = vld [vmem:[#allocation2 + $0xa0] sm:$0xff] }
 0x33d   :  { %1960 = vrcp.f32 %v506_v37  ;;  %v791_v37 = vld [vmem:[#allocation2 + $0x70] sm:$0xff] }
 0x33e   :  { %1962 = vrcp.f32 %v505_v38  ;;  %v873_v38 = vld [vmem:[#allocation2 + $0x98] sm:$0xff] }
 0x344   :  { %v2174_v39 = vpop.eup %1948 }
 0x345   :  { %v2177_v42 = vpop.eup %1950 }
 0x346   :  { %v2180_v45 = vpop.eup %1952 }
 0x347   :  { %v2182_v46 = vpop.eup %1954 }
 0x348   :  { %v2186_v51 = vpop.eup %1956 }
 0x349   :  { %v2188_v52 = vpop.eup %1958 }
 0x34a   :  { %v2192_v57 = vpop.eup %1960 }
 0x34b   :  { %v2194_v58 = vpop.eup %1962 }
 0x398   :  { %v542_v40 = vpop.permute.xlu0 %541 }
 0x399   :  { %v564_v41 = vmul.f32 %v2174_v39, %v542_v40  ;;  %v872_v40 = vld [vmem:[#allocation2 + $0x90] sm:$0xff] }
 0x39a   :  { %v540_v43 = vpop.permute.xlu1 %539 }
 0x39b   :  { %1964 = vtanh.f32 %v564_v41  ;;  %v563_v44 = vmul.f32 %v2177_v42, %v540_v43  ;;  %v871_v43 = vld [vmem:[#allocation2 + $0x88] sm:$0xff] }
 0x39d   :  { %1966 = vtanh.f32 %v563_v44  ;;  %v959_v44 = vld [vmem:[#allocation2 + $0xc0] sm:$0xff] }
 0x39e   :  { %v546_v47 = vpop.permute.xlu1 %545  ;;  %v544_v48 = vpop.permute.xlu0 %543 }
 0x39f   :  { %v566_v49 = vmul.f32 %v2180_v45, %v546_v47  ;;  %v565_v50 = vmul.f32 %v2182_v46, %v544_v48  ;;  %v1041_v47 = vld [vmem:[#allocation2 + $0xe0] sm:$0xff] }
 0x3a1   :  { %1968 = vtanh.f32 %v566_v49  ;;  %v957_v49 = vld [vmem:[#allocation2 + $0xb0] sm:$0xff] }
 0x3a2   :  { %1970 = vtanh.f32 %v565_v50  ;;  %v550_v53 = vpop.permute.xlu1 %549  ;;  %v548_v54 = vpop.permute.xlu0 %547  ;;  %v1040_v50 = vld [vmem:[#allocation2 + $0xd8] sm:$0xff] }
 0x3a3   :  { %v568_v55 = vmul.f32 %v2186_v51, %v550_v53  ;;  %v567_v56 = vmul.f32 %v2188_v52, %v548_v54  ;;  %v1039_v54 = vld [vmem:[#allocation2 + $0xd0] sm:$0xff] }
 0x3a5   :  { %1972 = vtanh.f32 %v568_v55  ;;  %v1038_v55 = vld [vmem:[#allocation2 + $0xc8] sm:$0xff] }
 0x3a6   :  { %1974 = vtanh.f32 %v567_v56  ;;  %v554_v59 = vpop.permute.xlu1 %553  ;;  %v552_v60 = vpop.permute.xlu0 %551  ;;  %v1125_v56 = vld [vmem:[#allocation2 + $0x100] sm:$0xff] }
 0x3a7   :  { %v570_v62 = vmul.f32 %v2192_v57, %v554_v59  ;;  %v569_v63 = vmul.f32 %v2194_v58, %v552_v60  ;;  %v1124_v59 = vld [vmem:[#allocation2 + $0xf8] sm:$0xff]  ;;  %v1205_v60 = vld [vmem:[#allocation2 + $0x120] sm:$0xff] }
 0x3a8   :  { %v1965_v61 = vpop.eup %1964 }
 0x3a9   :  { %589 = vrot.lane.b32.xlu0 %v1965_v61, %s2050_s13  ;;  %1976 = vtanh.f32 %v570_v62  ;;  %v1123_v61 = vld [vmem:[#allocation2 + $0xf0] sm:$0xff]  ;;  %v1204_v62 = vld [vmem:[#allocation2 + $0x118] sm:$0xff] }
 0x3aa   :  { %v1967_v0 = vpop.eup %1966  ;;  %1978 = vtanh.f32 %v569_v63 }
 0x3ab   :  { %587 = vrot.lane.b32.xlu1 %v1967_v0, %s2050_s13 }
 0x3ae   :  { %v1969_v1 = vpop.eup %1968 }
 0x3af   :  { %v1971_v2 = vpop.eup %1970  ;;  %593 = vrot.lane.b32.xlu1 %v1969_v1, %s2050_s13  ;;  %v1122_v1 = vld [vmem:[#allocation2 + $0xe8] sm:$0xff] }
 0x3b0   :  { %591 = vrot.lane.b32.xlu0 %v1971_v2, %s2050_s13  ;;  %v1203_v2 = vld [vmem:[#allocation2 + $0x110] sm:$0xff] }
 0x3b2   :  { %v1973_v3 = vpop.eup %1972 }
 0x3b3   :  { %v1975_v4 = vpop.eup %1974  ;;  %597 = vrot.lane.b32.xlu1 %v1973_v3, %s2050_s13  ;;  %v1202_v3 = vld [vmem:[#allocation2 + $0x108] sm:$0xff] }
 0x3b4   :  { %595 = vrot.lane.b32.xlu0 %v1975_v4, %s2050_s13  ;;  %v1304_v4 = vld [vmem:[#allocation2 + $0x1a0] sm:$0xff] }
 0x3b6   :  { %v1977_v7 = vpop.eup %1976 }
 0x3b7   :  { %v1979_v9 = vpop.eup %1978  ;;  %601 = vrot.lane.b32.xlu1 %v1977_v7, %s2050_s13  ;;  %v1301_v7 = vld [vmem:[#allocation2 + $0x188] sm:$0xff] }
 0x3b8   :  { %599 = vrot.lane.b32.xlu0 %v1979_v9, %s2050_s13  ;;  %v1300_v9 = vld [vmem:[#allocation2 + $0x180] sm:$0xff] }
 0x41b   :  { %v590_v16 = vpop.permute.xlu0 %589 }
 0x41c   :  { %v612_v17 = vmul.f32 %v2174_v39, %v590_v16  ;;  %v790_v39 = vld [vmem:[#allocation2 + $0x68] sm:$0xff] }
 0x41d   :  { %v588_v18 = vpop.permute.xlu1 %587  ;;  %v1293_v16 = vld [vmem:[#allocation2 + $0x148] sm:$0xff] }
 0x41e   :  { %638 = vrot.lane.b32.xlu0 %v612_v17, %s2051_s14  ;;  %v611_v19 = vmul.f32 %v2177_v42, %v588_v18  ;;  %v1291_v18 = vld [vmem:[#allocation2 + $0x138] sm:$0xff] }
 0x420   :  { %620 = vrot.lane.b32.xlu1 %v611_v19, %s2051_s14  ;;  %v1290_v19 = vld [vmem:[#allocation2 + $0x130] sm:$0xff] }
 0x421   :  { %v594_v20 = vpop.permute.xlu1 %593 }
 0x422   :  { %v2225_v21 = vmul.f32 %v2180_v45, %v594_v20  ;;  %v592_v22 = vpop.permute.xlu0 %591  ;;  %v1289_v20 = vld [vmem:[#allocation2 + $0x128] sm:$0xff] }
 0x423   :  { %v613_v23 = vmul.f32 %v2182_v46, %v592_v22  ;;  %v958_v46 = vld [vmem:[#allocation2 + $0xb8] sm:$0xff] }
 0x424   :  { %876 = vrot.lane.b32.xlu1 %v2225_v21, %s2051_s14  ;;  %v1395_v22 = vld [vmem:[#allocation2 + $0x218] sm:$0xff] }
 0x425   :  { %794 = vrot.lane.b32.xlu0 %v613_v23, %s2051_s14  ;;  %v598_v24 = vpop.permute.xlu1 %597 }
 0x426   :  { %v616_v25 = vmul.f32 %v2186_v51, %v598_v24  ;;  %v596_v26 = vpop.permute.xlu0 %595  ;;  %v1393_v24 = vld [vmem:[#allocation2 + $0x208] sm:$0xff] }
 0x427   :  { %v615_v27 = vmul.f32 %v2188_v52, %v596_v26  ;;  %v956_v52 = vld [vmem:[#allocation2 + $0xa8] sm:$0xff]  ;;  %v1391_v26 = vld [vmem:[#allocation2 + $0x1f8] sm:$0xff] }
 0x428   :  { %1042 = vrot.lane.b32.xlu1 %v616_v25, %s2051_s14 }
 0x429   :  { %952 = vrot.lane.b32.xlu0 %v615_v27, %s2051_s14  ;;  %v602_v28 = vpop.permute.xlu1 %601  ;;  %v1390_v27 = vld [vmem:[#allocation2 + $0x1f0] sm:$0xff] }
 0x42a   :  { %v2236_v29 = vmul.f32 %v2192_v57, %v602_v28  ;;  %v600_v30 = vpop.permute.xlu0 %599  ;;  %v1389_v28 = vld [vmem:[#allocation2 + $0x1e8] sm:$0xff] }
 0x42b   :  { %v617_v31 = vmul.f32 %v2194_v58, %v600_v30  ;;  %v1387_v30 = vld [vmem:[#allocation2 + $0x1d8] sm:$0xff] }
 0x42c   :  { %1207 = vrot.lane.b32.xlu1 %v2236_v29, %s2051_s14 }
 0x42d   :  { %1126 = vrot.lane.b32.xlu0 %v617_v31, %s2051_s14 }
 0x430   :  { %1034 = vrot.lane.b32.xlu1 %v616_v25, %s2049_s0  ;;  %v1392_v25 = vld [vmem:[#allocation2 + $0x200] sm:$0xff] }
 0x431   :  { %629 = vrot.lane.b32.xlu0 %v612_v17, %s2049_s0  ;;  %v1292_v17 = vld [vmem:[#allocation2 + $0x140] sm:$0xff] }
 0x434   :  { %1118 = vrot.lane.b32.xlu1 %v617_v31, %s2050_s13  ;;  %v1386_v31 = vld [vmem:[#allocation2 + $0x1d0] sm:$0xff] }
 0x435   :  { %785 = vrot.lane.b32.xlu0 %v613_v23, %s2050_s13  ;;  %v1394_v23 = vld [vmem:[#allocation2 + $0x210] sm:$0xff] }
 0x490   :  { %v639_v33 = vpop.permute.xlu0 %638 }
 0x491   :  { %1693 = vmatmul.mubr.msk.f32.vlgmr.msra.gmra.mxu0 %vm353_vm1, %v639_v33  ;;  %v1384_v33 = vld [vmem:[#allocation2 + $0x1c0] sm:$0xff] }
 0x492   :  { %1707 = vmatpush3.msra.mxu0 %v793_v32  ;;  %1714 = vmatprep.mubr.msk.f32.mxu0 %vm2053_vm2, %v2052_v8  ;;  %v621_v36 = vpop.permute.xlu1 %620  ;;  %v1385_v32 = vld [vmem:[#allocation2 + $0x1c8] sm:$0xff] }
 0x493   :  { %1708 = vmatprep.subr.mxu0 %v2052_v8  ;;  %623 = vst.msk [vmem:[#allocation5] sm:$0xff] %vm353_vm1, %v621_v36  ;;  %1704 = vmatmul.mubr.msk.f32.vlgmr.msra.gmra.mxu1 %vm353_vm1, %v621_v36 }
 0x494   :  { %1709 = vmatpush3.msra.mxu0 %v792_v34  ;;  %1718 = vmatpush3.msra.mxu1 %v874_v35 }
 0x495   :  { %1710 = vmatprep.subr.mxu0 %v2052_v8  ;;  %1719 = vmatprep.subr.mxu1 %v2052_v8 }
 0x496   :  { %1711 = vmatpush3.msra.mxu0 %v791_v37  ;;  %1720 = vmatpush3.msra.mxu1 %v873_v38  ;;  %v877_v41 = vpop.permute.xlu1 %876 }
 0x497   :  { %1712 = vmatprep.subr.mxu0 %v2052_v8  ;;  %1721 = vmatprep.subr.mxu1 %v2052_v8  ;;  %v795_v42 = vpop.permute.xlu0 %794 }
 0x498   :  { %1713 = vmatpush3.msra.mxu0 %v790_v39  ;;  %1722 = vmatpush3.msra.mxu1 %v872_v40 }
 0x499   :  { %1715 = vmatmul.mubr.msk.f32.vlgmr.msra.gmra.mxu0 %vm353_vm1, %v795_v42  ;;  %1723 = vmatprep.subr.mxu1 %v2052_v8 }
 0x49a   :  { %1728 = vmatprep.subr.mxu0 %v2052_v8  ;;  %1724 = vmatpush3.msra.mxu1 %v871_v43  ;;  %v1043_v45 = vpop.permute.xlu1 %1042 }
 0x49b   :  { %1725 = vmatprep.mubr.msk.f32.mxu1 %vm2053_vm2, %v2052_v8  ;;  %1729 = vmatpush3.msra.mxu0 %v959_v44  ;;  %v953_v48 = vpop.permute.xlu0 %952 }
 0x49c   :  { %1726 = vmatmul.mubr.msk.f32.vlgmr.msra.gmra.mxu1 %vm353_vm1, %v877_v41  ;;  %1739 = vmatprep.subr.mxu1 %v2052_v8  ;;  %955 = vst.msk [vmem:[#allocation5 + $0x8] sm:$0xff] %vm353_vm1, %v953_v48 }
 0x49d   :  { %1730 = vmatprep.subr.mxu0 %v2052_v8  ;;  %1740 = vmatpush3.msra.mxu1 %v1041_v47 }
 0x49e   :  { %1731 = vmatpush3.msra.mxu0 %v958_v46  ;;  %1741 = vmatprep.subr.mxu1 %v2052_v8  ;;  %v1208_v51 = vpop.permute.xlu1 %1207 }
 0x49f   :  { %1732 = vmatprep.subr.mxu0 %v2052_v8  ;;  %1742 = vmatpush3.msra.mxu1 %v1040_v50  ;;  %v1127_v53 = vpop.permute.xlu0 %1126 }
 0x4a0   :  { %1733 = vmatpush3.msra.mxu0 %v957_v49  ;;  %1743 = vmatprep.subr.mxu1 %v2052_v8 }
 0x4a1   :  { %1734 = vmatprep.subr.mxu0 %v2052_v8  ;;  %1736 = vmatprep.mubr.msk.f32.mxu0 %vm2053_vm2, %v2052_v8 }
 0x4a2   :  { %1735 = vmatpush3.msra.mxu0 %v956_v52  ;;  %1744 = vmatpush3.msra.mxu1 %v1039_v54  ;;  %v1035_v57 = vpop.permute.xlu1 %1034 }
 0x4a3   :  { %1737 = vmatmul.mubr.msk.f32.vlgmr.msra.gmra.mxu0 %vm353_vm1, %v953_v48  ;;  %1745 = vmatprep.subr.mxu1 %v2052_v8  ;;  %1037 = vst.msk [vmem:[#allocation5 + $0x8] sm:$0xff] %vm632_vm3, %v1035_v57  ;;  %v630_v58 = vpop.permute.xlu0 %629 }
 0x4a4   :  { %1750 = vmatprep.subr.mxu0 %v2052_v8  ;;  %1746 = vmatpush3.msra.mxu1 %v1038_v55  ;;  %633 = vst.msk [vmem:[#allocation5] sm:$0xff] %vm632_vm3, %v630_v58  ;;  %v1551_v55 = vld [vmem:[%s2350_s2 + $0x2] ss:$0 sm:$0xff] }
 0x4a5   :  { %1747 = vmatprep.mubr.msk.f32.mxu1 %vm2053_vm2, %v2052_v8  ;;  %1751 = vmatpush3.msra.mxu0 %v1125_v56 }
 0x4a6   :  { %1748 = vmatmul.mubr.msk.f32.vlgmr.msra.gmra.mxu1 %vm353_vm1, %v1043_v45  ;;  %1761 = vmatprep.subr.mxu1 %v2052_v8  ;;  %v1119_v63 = vpop.permute.xlu1 %1118 }
 0x4a7   :  { %1752 = vmatprep.subr.mxu0 %v2052_v8  ;;  %1762 = vmatpush3.msra.mxu1 %v1205_v60  ;;  %1121 = vst.msk [vmem:[#allocation5 + $0x8] sm:$0xff] %vm788_vm4, %v1119_v63  ;;  %v786_v0 = vpop.permute.xlu0 %785  ;;  %v1383_v60 = vld [vmem:[#allocation2 + $0x1b8] sm:$0xff]  ;;  %v1552_v63 = vld [vmem:[%s2350_s2 + $0x3] ss:$0 sm:$0xff] }
 0x4a8   :  { %1753 = vmatpush3.msra.mxu0 %v1124_v59  ;;  %1763 = vmatprep.subr.mxu1 %v2052_v8  ;;  %789 = vst.msk [vmem:[#allocation5] sm:$0xff] %vm788_vm4, %v786_v0 }
 0x4a9   :  { %1754 = vmatprep.subr.mxu0 %v2052_v8  ;;  %1201 = vst.msk [vmem:[#allocation5 + $0x8] sm:$0xff] %vm869_vm5, %v2236_v29  ;;  %1764 = vmatpush3.msra.mxu1 %v1204_v62  ;;  %870 = vst.msk [vmem:[#allocation5] sm:$0xff] %vm869_vm5, %v2225_v21  ;;  %v1396_v21 = vld [vmem:[#allocation2 + $0x220] sm:$0xff]  ;;  %v1381_v62 = vld [vmem:[#allocation2 + $0x1a8] sm:$0xff] }
 0x4aa   :  { %1755 = vmatpush3.msra.mxu0 %v1123_v61  ;;  %1765 = vmatprep.subr.mxu1 %v2052_v8  ;;  %v1388_v29 = vld [vmem:[#allocation2 + $0x1e0] sm:$0xff]  ;;  %v1382_v61 = vld [vmem:[#allocation2 + $0x1b0] sm:$0xff] }
 0x4ab   :  { %1756 = vmatprep.subr.mxu0 %v2052_v8  ;;  %1758 = vmatprep.mubr.msk.f32.mxu0 %vm2053_vm2, %v2052_v8 }
 0x4ac   :  { %1757 = vmatpush3.msra.mxu0 %v1122_v1  ;;  %1766 = vmatpush3.msra.mxu1 %v1203_v2 }
 0x4ad   :  { %1759 = vmatmul.mubr.msk.f32.vlgmr.msra.gmra.mxu0 %vm353_vm1, %v1127_v53  ;;  %1767 = vmatprep.subr.mxu1 %v2052_v8 }
 0x4ae   :  { %1769 = vmatprep.mubr.msk.f32.mxu1 %vm2053_vm2, %v2052_v8  ;;  %1768 = vmatpush3.msra.mxu1 %v1202_v3 }
 0x4af   :  { %1772 = vmatprep.subr.mxu0 %v2052_v8  ;;  %1770 = vmatmul.mubr.msk.f32.vlgmr.msra.gmra.mxu1 %vm353_vm1, %v1208_v51 }
 0x4b0   :  { %1804 = vmatprep.mubr.msk.f32.mxu0 %vm2053_vm2, %v2052_v8  ;;  %1807 = vmatprep.subr.mxu1 %v2052_v8 }
 0x4b1   :  { %1839 = vmatprep.mubr.msk.f32.mxu1 %vm2053_vm2, %v2052_v8  ;;  %1773 = vmatpush3.msra.mxu0 %v1304_v4 }
 0x4b2   :  { %1774 = vmatprep.subr.mxu0 %v2052_v8  ;;  %1808 = vmatpush3.msra.mxu1 %v1396_v21 }
 0x4b3   :  { %1775 = vmatpush3.msra.mxu0 %v1303_v5  ;;  %1809 = vmatprep.subr.mxu1 %v2052_v8 }
 0x4b4   :  { %1776 = vmatprep.subr.mxu0 %v2052_v8  ;;  %1810 = vmatpush3.msra.mxu1 %v1395_v22 }
 0x4b5   :  { %1777 = vmatpush3.msra.mxu0 %v1302_v6  ;;  %1811 = vmatprep.subr.mxu1 %v2052_v8 }
 0x4b6   :  { %1778 = vmatprep.subr.mxu0 %v2052_v8  ;;  %1812 = vmatpush3.msra.mxu1 %v1394_v23 }
 0x4b7   :  { %1779 = vmatpush3.msra.mxu0 %v1301_v7  ;;  %1813 = vmatprep.subr.mxu1 %v2052_v8 }
 0x4b8   :  { %1780 = vmatprep.subr.mxu0 %v2052_v8  ;;  %1814 = vmatpush3.msra.mxu1 %v1393_v24 }
 0x4b9   :  { %1781 = vmatpush3.msra.mxu0 %v1300_v9  ;;  %1815 = vmatprep.subr.mxu1 %v2052_v8 }
 0x4ba   :  { %1782 = vmatprep.subr.mxu0 %v2052_v8  ;;  %1816 = vmatpush3.msra.mxu1 %v1392_v25 }
 0x4bb   :  { %1783 = vmatpush3.msra.mxu0 %v1299_v10  ;;  %1817 = vmatprep.subr.mxu1 %v2052_v8 }
 0x4bc   :  { %1784 = vmatprep.subr.mxu0 %v2052_v8  ;;  %1818 = vmatpush3.msra.mxu1 %v1391_v26 }
 0x4bd   :  { %1785 = vmatpush3.msra.mxu0 %v1298_v11  ;;  %1819 = vmatprep.subr.mxu1 %v2052_v8 }
 0x4be   :  { %1786 = vmatprep.subr.mxu0 %v2052_v8  ;;  %1820 = vmatpush3.msra.mxu1 %v1390_v27 }
 0x4bf   :  { %1787 = vmatpush3.msra.mxu0 %v1297_v12  ;;  %1821 = vmatprep.subr.mxu1 %v2052_v8 }
 0x4c0   :  { %1788 = vmatprep.subr.mxu0 %v2052_v8  ;;  %1822 = vmatpush3.msra.mxu1 %v1389_v28 }
 0x4c1   :  { %1789 = vmatpush3.msra.mxu0 %v1296_v13  ;;  %1823 = vmatprep.subr.mxu1 %v2052_v8 }
 0x4c2   :  { %1790 = vmatprep.subr.mxu0 %v2052_v8  ;;  %1824 = vmatpush3.msra.mxu1 %v1388_v29 }
 0x4c3   :  { %1791 = vmatpush3.msra.mxu0 %v1295_v14  ;;  %1825 = vmatprep.subr.mxu1 %v2052_v8 }
 0x4c4   :  { %1792 = vmatprep.subr.mxu0 %v2052_v8  ;;  %1826 = vmatpush3.msra.mxu1 %v1387_v30 }
 0x4c5   :  { %1793 = vmatpush3.msra.mxu0 %v1294_v15  ;;  %1827 = vmatprep.subr.mxu1 %v2052_v8 }
 0x4c6   :  { %1794 = vmatprep.subr.mxu0 %v2052_v8  ;;  %1828 = vmatpush3.msra.mxu1 %v1386_v31 }
 0x4c7   :  { %1795 = vmatpush3.msra.mxu0 %v1293_v16  ;;  %1829 = vmatprep.subr.mxu1 %v2052_v8 }
 0x4c8   :  { %1796 = vmatprep.subr.mxu0 %v2052_v8  ;;  %1830 = vmatpush3.msra.mxu1 %v1385_v32 }
 0x4c9   :  { %1797 = vmatpush3.msra.mxu0 %v1292_v17  ;;  %1831 = vmatprep.subr.mxu1 %v2052_v8 }
 0x4ca   :  { %1798 = vmatprep.subr.mxu0 %v2052_v8  ;;  %1832 = vmatpush3.msra.mxu1 %v1384_v33 }
 0x4cb   :  { %1799 = vmatpush3.msra.mxu0 %v1291_v18  ;;  %1833 = vmatprep.subr.mxu1 %v2052_v8 }
 0x4cc   :  { %1800 = vmatprep.subr.mxu0 %v2052_v8  ;;  %1834 = vmatpush3.msra.mxu1 %v1383_v60 }
 0x4cd   :  { %1801 = vmatpush3.msra.mxu0 %v1290_v19  ;;  %1835 = vmatprep.subr.mxu1 %v2052_v8 }
 0x4ce   :  { %1802 = vmatprep.subr.mxu0 %v2052_v8  ;;  %1836 = vmatpush3.msra.mxu1 %v1382_v61 }
 0x4cf   :  { %1803 = vmatpush3.msra.mxu0 %v1289_v20  ;;  %1837 = vmatprep.subr.mxu1 %v2052_v8 }
 0x4d0   :  { %1838 = vmatpush3.msra.mxu1 %v1381_v62 }
 0x551   :  { %v708_v34 = vpop.f32.mrf.mxu0 }
 0x553   :  { %v1694_v35 = vpop.f32.mrf.mxu0  ;;  %v780_v36 = vpop.f32.mrf.mxu1 }
 0x554   :  { %v781_v42 = vadd.f32 %v780_v36, %v708_v34 }
 0x555   :  { %v1705_v37 = vpop.f32.mrf.mxu1 }
 0x559   :  { %v864_v38 = vpop.f32.mrf.mxu0 }
 0x55a   :  { %v868_v43 = vadd.f32 %v864_v38, %v781_v42 }
 0x55b   :  { %v1716_v39 = vpop.f32.mrf.mxu0 }
 0x55c   :  { %v946_v40 = vpop.f32.mrf.mxu1 }
 0x55d   :  { %v950_v46 = vadd.f32 %v946_v40, %v868_v43 }
 0x55e   :  { %v1727_v41 = vpop.f32.mrf.mxu1 }
 0x563   :  { %v1028_v44 = vpop.f32.mrf.mxu0 }
 0x564   :  { %v1032_v48 = vadd.f32 %v1028_v44, %v950_v46 }
 0x565   :  { %v1738_v45 = vpop.f32.mrf.mxu0 }
 0x566   :  { %v1112_v47 = vpop.f32.mrf.mxu1 }
 0x567   :  { %v1116_v50 = vadd.f32 %v1112_v47, %v1032_v48 }
 0x568   :  { %v1749_v49 = vpop.f32.mrf.mxu1 }
 0x56d   :  { %v1196_v51 = vpop.f32.mrf.mxu0 }
 0x56e   :  { %v1200_v52 = vadd.f32 %v1196_v51, %v1116_v50 }
 0x56f   :  { %v1760_v53 = vpop.f32.mrf.mxu0  ;;  %v1277_v54 = vpop.f32.mrf.mxu1 }
 0x570   :  { %v1281_v56 = vadd.f32 %v1277_v54, %v1200_v52 }
 0x571   :  { %v1771_v57 = vpop.f32.mrf.mxu1 }
 0x572   :  { %v1287_v58 = vadd.f32 %v1551_v55, %v1281_v56 }
 0x574   :  { %v1288_v59 = vmax.f32 %v1287_v58, 0.0 }
 0x576   :  { %1805 = vmatmul.mubr.f32.vlgmr.msra.gmra.mxu0 %v1288_v59 }
 0x636   :  { %v1376_v0 = vpop.f32.mrf.mxu0 }
 0x637   :  { %v1377_v1 = vadd.f32 %v1552_v63, %v1376_v0 }
 0x638   :  { %v1806_v2 = vpop.f32.mrf.mxu0 }
 0x639   :  { %v1380_v3 = vmax.f32 %v1377_v1, 0.0 }
 0x63b   :  { %1840 = vmatmul.mubr.f32.vlgmr.msra.gmra.mxu1 %v1380_v3 }
 0x63c   :  { %2011 = shalt.err (!%p2008_p9)
}
 0x63d   :  { %1489 = dma.vmem_to_hbm [thread:$0]  %s1487_s22, 256, %s2351_s3, [#allocation4]   ;;  %v1554_v8 = vld [vmem:[%s2350_s2 + $0x5] ss:$0 sm:$0xff]  ;;  %v1553_v4 = vld [vmem:[%s2350_s2 + $0x4] ss:$0 sm:$0xff] }
 0x63e   :  { %s2055_s29 = smov [#allocation6]   ;;  %v1477_v6 = vmul.f32 %v1554_v8, %v1377_v1 }
 0x63f   :  { %s1496_s30 = sshll.u32 %s2055_s29, 4  ;;  %s1497_s30 = int_to_ptr.vmem [resolvable:$true] %s1496_s30 }
 0x640   :  { %s2020_s5 = scalar_lea.vmem %s1497_s30, 128  ;;  %p2025_p11 = scmp.lt.s32.totalorder %s1497_s30, %s1497_s30 }
 0x641   :  { %p2021_p10 = scmp.ne.s32.totalorder %s1497_s30, %s2020_s5  ;;  %p2026_p12 = scmp.lt.s32.totalorder %s2020_s5, %s2020_s5 }
 0x643   :  { %p2027_p13 = por %p2026_p12, %p2025_p11 }
 0x645   :  { %p2028_p0 = pnand %p2027_p13, %p2021_p10 }
 0x6fb   :  { %v1468_v5 = vpop.f32.mrf.mxu1 }
 0x6fc   :  { %v1469_v7 = vadd.f32 %v1553_v4, %v1468_v5 }
 0x6fd   :  { %v1841_v9 = vpop.f32.mrf.mxu1 }
 0x6fe   :  { %v1478_v10 = vadd.f32 %v1477_v6, %v1469_v7 }
 0x700   :  { %1479 = vst [vmem:[#allocation6] sm:$0xff] %v1478_v10 }
 0x701   :  { %2031 = shalt.err (!%p2028_p0)
}
 0x702   :  { %1499 = dma.vmem_to_hbm [thread:$0]  %s1497_s30, 128, %s2352_s4, [#allocation7]  }
 0x703   :  { %2042 = dma.done.wait [#allocation4], 256  }
 0x704   :  { %2043 = vsyncadd [#allocation4], 4294967040 }
 0x705   :  { %2044 = dma.done.wait [#allocation7], 128  }
 0x706   :  { %2045 = vsyncadd [#allocation7], 4294967168 }
 0x707   :  { %1506 = vsyncpa [#allocation3], 1 }
 0x708   :  { %1507 = vsyncpa [#allocation4], 1 }
 0x709   :  { %1508 = vsyncpa [#allocation7], 1 }

</bundles_post_ra>
